<compile_context>
chip_gen: v6e
topology: v6e:2x2x1
jax: 0.10.0
libtpu: 0.0.40
codegen_flags: <defaults>
</compile_context>

<pallas_src>
import functools

import jax
import jax.numpy as jnp
from jax.experimental import pallas as pl
from jax.experimental.pallas import tpu as pltpu


def nerf_encoding_kernel(x_ref, w1_ref, b1_ref, w2_ref, b2_ref, o_ref):
    """Fused Linear -> ReLU -> Linear on one (tm, pack*in_dim) tile of packed rows."""
    x = x_ref[...]
    h = jnp.dot(x, w1_ref[...], preferred_element_type=jnp.float32) + b1_ref[...]
    h = jnp.maximum(h, 0.0)
    y = jnp.dot(h.astype(w2_ref.dtype), w2_ref[...],
                preferred_element_type=jnp.float32) + b2_ref[...]
    o_ref[...] = y.astype(o_ref.dtype)


def _round_up(a, b):
    return ((a + b - 1) // b) * b


def _vmem_cap_bytes():
    """~75% of physical per-core VMEM (v5e/v6e: 128 MiB, v7x: 64 MiB)."""
    try:
        info = pltpu.get_tpu_info()
        phys = int(getattr(info, "vmem_capacity_bytes", 64 << 20))
    except Exception:  # non-TPU tracing environments
        phys = 64 << 20
    return (phys * 3) // 4


_TM_MAX = 8192        # packed rows/step: ~4 MiB f32 x-tile -> per-step overhead ~10%
_TM_MIN = 512         # don't shrink tiles below this when splitting for multi-core
_TARGET_STEPS = 4     # even and >= 2: keeps both v7x TensorCores busy and balanced


def _choose_row_tile(rows, tm):
    if tm is not None:
        cand = int(tm)
    else:
        cand = min(_TM_MAX, max(_TM_MIN, -(-rows // _TARGET_STEPS)))
    if cand >= rows:
        return rows                    # one block == full array dim (any size legal)
    cand = _round_up(cand, 8)          # partial edge blocks need 8-aligned block dim
    return rows if cand >= rows else cand


@functools.partial(jax.jit, static_argnames=("tm", "pack"))
def nerf_encoding(x, w1, b1, w2, b2, *, tm=None, pack=None):
    """x: (..., in_dim) -> (..., out_dim).

    w1: (in_dim, W), b1: (W,), w2: (W, out_dim), b2: (out_dim,)
    (weights are stored pre-transposed relative to torch.nn.Linear).
    Output dtype follows x.dtype; params are expected in the same dtype as x.

    tm   : row tile in *packed* rows (None = auto; sweepable).
    pack : samples packed side-by-side on lanes; default 128 // in_dim when exact.
    """
    in_dim = x.shape[-1]
    W = w1.shape[1]
    out_dim = w2.shape[1]
    lead = x.shape[:-1]

    # --- lane packing factor --------------------------------------------------
    if pack is None:
        pack = 128 // in_dim if (in_dim <= 128 and 128 % in_dim == 0) else 1
    Pin, Pw, Pout = pack * in_dim, pack * W, pack * out_dim

    # --- pack samples onto lanes; only a tiny tail pad when n % pack != 0 ------
    x2 = x.reshape(-1, in_dim)
    n = x2.shape[0]
    rows = -(-n // pack)                       # packed rows (static python int)
    if n % pack != 0:
        x2 = jnp.pad(x2, ((0, rows * pack - n), (0, 0)))   # <= pack-1 rows
    xp = x2.reshape(rows, Pin)                 # contiguous -> free, lane-dense rows

    # --- row tile & grid (partial edge block handles the ragged tail) ----------
    tm_eff = _choose_row_tile(rows, tm)

    # --- VMEM budget: double-buffered x/out tiles + resident packed weights ----
    x_isz = jnp.dtype(x.dtype).itemsize
    w_isz = jnp.dtype(w1.dtype).itemsize
    w_bytes = 2 * (Pin * Pw + Pw * Pout + Pw + Pout) * w_isz

    def _buf_bytes(t):
        return 2 * t * (Pin + Pout) * x_isz + w_bytes

    cap = _vmem_cap_bytes()
    while _buf_bytes(tm_eff) > cap - (8 << 20) and tm_eff > 64:
        tm_eff = max(64, _round_up(tm_eff // 2, 8))
        if tm_eff > rows:
            tm_eff = rows
    vmem_limit = int(min(cap, max(32 << 20, _buf_bytes(tm_eff) + (8 << 20))))

    grid = pl.cdiv(rows, tm_eff)

    # --- block-diagonal packed weights (tiny, VMEM-resident; exact zeros) ------
    w1_bd = jnp.kron(jnp.eye(pack, dtype=w1.dtype), w1)     # (Pin, Pw)
    w2_bd = jnp.kron(jnp.eye(pack, dtype=w2.dtype), w2)     # (Pw, Pout)
    b1_bd = jnp.tile(b1.reshape(1, W), (1, pack))            # (1, Pw)
    b2_bd = jnp.tile(b2.reshape(1, out_dim), (1, pack))      # (1, Pout)

    flops = 2 * rows * (Pin * Pw + Pw * Pout)
    bytes_accessed = (rows * (Pin + Pout) * x_isz
                      + (Pin * Pw + Pw * Pout + Pw + Pout) * w_isz)

    out = pl.pallas_call(
        nerf_encoding_kernel,
        out_shape=jax.ShapeDtypeStruct((rows, Pout), x.dtype),
        grid_spec=pl.GridSpec(
            grid=(grid,),
            in_specs=[
                pl.BlockSpec((tm_eff, Pin), lambda i: (i, 0)),   # packed x rows (streamed)
                pl.BlockSpec((Pin, Pw), lambda i: (0, 0)),       # w1 block-diag (resident)
                pl.BlockSpec((1, Pw), lambda i: (0, 0)),         # b1
                pl.BlockSpec((Pw, Pout), lambda i: (0, 0)),      # w2 block-diag (resident)
                pl.BlockSpec((1, Pout), lambda i: (0, 0)),       # b2
            ],
            out_specs=pl.BlockSpec((tm_eff, Pout), lambda i: (i, 0)),
        ),
        compiler_params=pltpu.CompilerParams(
            dimension_semantics=("parallel",),
            vmem_limit_bytes=vmem_limit,
        ),
        cost_estimate=pl.CostEstimate(
            flops=flops, transcendentals=0, bytes_accessed=bytes_accessed),
    )(xp, w1_bd, b1_bd, w2_bd, b2_bd)

    # --- unpack lanes back to per-sample rows (no copy when n % pack == 0) -----
    if n == rows * pack:
        y = out.reshape(n, out_dim)
    else:
        y = out.reshape(rows * pack, out_dim)[:n]
    return y.reshape(*lead, out_dim)


def init_nerf_encoding_params(key, in_dim, W, out_dim, dtype=jnp.float32):
    """torch.nn.Linear-style init (uniform +/- 1/sqrt(fan_in)); weights pre-transposed."""
    k1, k2, k3, k4 = jax.random.split(key, 4)
    bound1 = 1.0 / (in_dim ** 0.5)
    w1 = jax.random.uniform(k1, (in_dim, W), dtype, -bound1, bound1)
    b1 = jax.random.uniform(k2, (W,), dtype, -bound1, bound1)
    bound2 = 1.0 / (W ** 0.5)
    w2 = jax.random.uniform(k3, (W, out_dim), dtype, -bound2, bound2)
    b2 = jax.random.uniform(k4, (out_dim,), dtype, -bound2, bound2)
    return w1, b1, w2, b2


if __name__ == "__main__":
    in_dim, W_hid, out_dim = 32, 64, 4
    key = jax.random.PRNGKey(0)
    kx, kx2, kp = jax.random.split(key, 3)
    w1, b1, w2, b2 = init_nerf_encoding_params(kp, in_dim, W_hid, out_dim)

    # Small shapes consistent with the module: batch=2, seq(points)=8, in_dim=32.
    x_small = jax.random.normal(kx, (2, 8, in_dim), dtype=jnp.float32)
    out_small = jax.block_until_ready(nerf_encoding(x_small, w1, b1, w2, b2))
    ref_small = jnp.maximum(x_small @ w1 + b1, 0.0) @ w2 + b2
    assert out_small.shape == (2, 8, out_dim)
    assert jnp.allclose(out_small, ref_small, atol=1e-4, rtol=1e-4)

    # Non-divisible row count (4011 samples): exercises the tail pad (n % pack != 0),
    # the partial edge block, and grid >= 2 (both v7x TensorCores active).
    x_big = jax.random.normal(kx2, (7, 573, in_dim), dtype=jnp.float32)
    out_big = jax.block_until_ready(nerf_encoding(x_big, w1, b1, w2, b2))
    ref_big = jnp.maximum(x_big @ w1 + b1, 0.0) @ w2 + b2
    assert out_big.shape == (7, 573, out_dim)
    assert jnp.allclose(out_big, ref_big, atol=1e-4, rtol=1e-4)

    # bf16 I/O path (preferred for the bandwidth-bound deployment case, esp. v5e).
    xb = x_big.astype(jnp.bfloat16)
    w1b, b1b, w2b, b2b = (p.astype(jnp.bfloat16) for p in (w1, b1, w2, b2))
    out_bf16 = jax.block_until_ready(nerf_encoding(xb, w1b, b1b, w2b, b2b))
    ref_bf16 = (jnp.maximum(xb.astype(jnp.float32) @ w1b.astype(jnp.float32)
                            + b1b.astype(jnp.float32), 0.0)
                @ w2b.astype(jnp.float32) + b2b.astype(jnp.float32))
    assert jnp.allclose(out_bf16.astype(jnp.float32), ref_bf16, atol=1e-1, rtol=5e-2)

    print("KERNEL_OK")
</pallas_src>

<mosaic_0001>
module attributes {stable_mosaic.version = 11 : i64} {
  func.func @nerf_encoding_kernel(%arg0: i32, %arg1: memref<4x128xf32, #tpu.memory_space<vmem>>, %arg2: memref<128x256xf32, #tpu.memory_space<vmem>>, %arg3: memref<1x256xf32, #tpu.memory_space<vmem>>, %arg4: memref<256x16xf32, #tpu.memory_space<vmem>>, %arg5: memref<1x16xf32, #tpu.memory_space<vmem>>, %arg6: memref<4x16xf32, #tpu.memory_space<vmem>>) attributes {dimension_semantics = [#tpu.dimension_semantics<parallel>], iteration_bounds = array<i64: 1>, scalar_prefetch = 0 : i64, scratch_operands = 0 : i64, tpu.core_type = #tpu.core_type<tc>, window_params = [{transform_indices = @transform_0, window_bounds = array<i64: 4, 128>}, {pipeline_mode = #tpu.pipeline_mode<synchronous>, transform_indices = @transform_1, window_bounds = array<i64: 128, 256>}, {pipeline_mode = #tpu.pipeline_mode<synchronous>, transform_indices = @transform_2, window_bounds = array<i64: 1, 256>}, {pipeline_mode = #tpu.pipeline_mode<synchronous>, transform_indices = @transform_3, window_bounds = array<i64: 256, 16>}, {pipeline_mode = #tpu.pipeline_mode<synchronous>, transform_indices = @transform_4, window_bounds = array<i64: 1, 16>}, {transform_indices = @transform_5, window_bounds = array<i64: 4, 16>}]} {
    %c0 = arith.constant 0 : index
    %c0_0 = arith.constant 0 : index
    %0 = vector.load %arg1[%c0, %c0_0] : memref<4x128xf32, #tpu.memory_space<vmem>>, vector<4x128xf32>
    %c0_1 = arith.constant 0 : index
    %c0_2 = arith.constant 0 : index
    %1 = vector.load %arg2[%c0_1, %c0_2] : memref<128x256xf32, #tpu.memory_space<vmem>>, vector<128x256xf32>
    %cst = arith.constant dense<0.000000e+00> : vector<4x256xf32>
    %2 = tpu.matmul %0, %1, %cst {dimension_numbers = #tpu.dot_dimension_numbers<[1], [0], [0], [1], [0, 0, 1, 1], [], []>} : vector<4x128xf32>, vector<128x256xf32>, vector<4x256xf32> -> vector<4x256xf32>
    %c0_3 = arith.constant 0 : index
    %c0_4 = arith.constant 0 : index
    %3 = vector.load %arg3[%c0_3, %c0_4] : memref<1x256xf32, #tpu.memory_space<vmem>>, vector<1x256xf32>
    %4 = vector.broadcast %3 : vector<1x256xf32> to vector<4x256xf32>
    %5 = arith.addf %2, %4 : vector<4x256xf32>
    %cst_5 = arith.constant 0.000000e+00 : f32
    %6 = vector.broadcast %cst_5 : f32 to vector<4x256xf32>
    %7 = arith.maximumf %5, %6 : vector<4x256xf32>
    %c0_6 = arith.constant 0 : index
    %c0_7 = arith.constant 0 : index
    %8 = vector.load %arg4[%c0_6, %c0_7] : memref<256x16xf32, #tpu.memory_space<vmem>>, vector<256x16xf32>
    %cst_8 = arith.constant dense<0.000000e+00> : vector<4x16xf32>
    %9 = tpu.matmul %7, %8, %cst_8 {dimension_numbers = #tpu.dot_dimension_numbers<[1], [0], [0], [1], [0, 0, 1, 1], [], []>} : vector<4x256xf32>, vector<256x16xf32>, vector<4x16xf32> -> vector<4x16xf32>
    %c0_9 = arith.constant 0 : index
    %c0_10 = arith.constant 0 : index
    %10 = vector.load %arg5[%c0_9, %c0_10] : memref<1x16xf32, #tpu.memory_space<vmem>>, vector<1x16xf32>
    %11 = vector.broadcast %10 : vector<1x16xf32> to vector<4x16xf32>
    %12 = arith.addf %9, %11 : vector<4x16xf32>
    %c0_11 = arith.constant 0 : index
    %c0_12 = arith.constant 0 : index
    %13 = vector.load %arg6[%c0_11, %c0_12] : memref<4x16xf32, #tpu.memory_space<vmem>>, vector<4x16xf32>
    tpu.vector_store %arg6[%c0_11, %c0_12], %12 {strides = array<i32>} : memref<4x16xf32, #tpu.memory_space<vmem>>, vector<4x16xf32>,
    return
  }
  func.func @transform_0(%arg0: i32) -> (i32, i32) {
    %c0_i32 = arith.constant 0 : i32
    %c0_i32_0 = arith.constant 0 : i32
    return %arg0, %c0_i32 : i32, i32
  }
  func.func @transform_1(%arg0: i32) -> (i32, i32) {
    %c0_i32 = arith.constant 0 : i32
    %c0_i32_0 = arith.constant 0 : i32
    %c0_i32_1 = arith.constant 0 : i32
    return %c0_i32, %c0_i32_0 : i32, i32
  }
  func.func @transform_2(%arg0: i32) -> (i32, i32) {
    %c0_i32 = arith.constant 0 : i32
    %c0_i32_0 = arith.constant 0 : i32
    %c0_i32_1 = arith.constant 0 : i32
    return %c0_i32, %c0_i32_0 : i32, i32
  }
  func.func @transform_3(%arg0: i32) -> (i32, i32) {
    %c0_i32 = arith.constant 0 : i32
    %c0_i32_0 = arith.constant 0 : i32
    %c0_i32_1 = arith.constant 0 : i32
    return %c0_i32, %c0_i32_0 : i32, i32
  }
  func.func @transform_4(%arg0: i32) -> (i32, i32) {
    %c0_i32 = arith.constant 0 : i32
    %c0_i32_0 = arith.constant 0 : i32
    %c0_i32_1 = arith.constant 0 : i32
    return %c0_i32, %c0_i32_0 : i32, i32
  }
  func.func @transform_5(%arg0: i32) -> (i32, i32) {
    %c0_i32 = arith.constant 0 : i32
    %c0_i32_0 = arith.constant 0 : i32
    return %arg0, %c0_i32 : i32, i32
  }
}

</mosaic_0001>

<bundles_post_ra>
// kernel: nerf_encoding.1
= control target key start
LH: loop header
LB: loop body
LE: loop exit
PB: predicated region body
PF: predicated region fallthrough
CT: control target
= control target key end

     0   :  { %v290_v3 = vmov 0.0   ;;  %vm247_vm0 = vcmask 125952   ;;  %s525_s1 = inlined_call_operand.vmem [shape: f32[128,256], index: 1, kind: input, shape index: {}]   ;;  %s526_s3 = inlined_call_operand.vmem [shape: f32[256,16], index: 3, kind: input, shape index: {}]   ;;  %s527_s0 = inlined_call_operand.vmem [shape: f32[4,128], index: 0, kind: input, shape index: {}]   ;;  %s528_s2 = inlined_call_operand.vmem [shape: f32[1,256], index: 2, kind: input, shape index: {}]   ;;  %s529_s4 = inlined_call_operand.vmem [shape: f32[1,16], index: 4, kind: input, shape index: {}]   ;;  %s530_s5 = inlined_call_operand.vmem [shape: f32[4,16], index: 5, kind: output, shape index: {}]  }
   0x1   :  { %v52_v0 = vld [vmem:[%s525_s1 + $0xf8] sm:$0xff]  ;;  %v51_v1 = vld [vmem:[%s525_s1 + $0xf0] sm:$0xff]  ;;  %v50_v2 = vld [vmem:[%s525_s1 + $0xe8] sm:$0xff]  ;;  %129 = vmatprep.mubr.f32.mxu0 %v290_v3 }
   0x2   :  { %65 = vmatprep.subr.mxu0 %v52_v0  ;;  %v49_v4 = vld [vmem:[%s525_s1 + $0xe0] sm:$0xff]  ;;  %v48_v5 = vld [vmem:[%s525_s1 + $0xd8] sm:$0xff]  ;;  %v47_v6 = vld [vmem:[%s525_s1 + $0xd0] sm:$0xff] }
   0x3   :  { %66 = vmatpush1.msra.mxu0 %v51_v1  ;;  %v46_v7 = vld [vmem:[%s525_s1 + $0xc8] sm:$0xff]  ;;  %v45_v8 = vld [vmem:[%s525_s1 + $0xc0] sm:$0xff]  ;;  %v44_v9 = vld [vmem:[%s525_s1 + $0xb8] sm:$0xff] }
   0x4   :  { %67 = vmatprep.subr.mxu0 %v50_v2  ;;  %v43_v10 = vld [vmem:[%s525_s1 + $0xb0] sm:$0xff]  ;;  %v42_v11 = vld [vmem:[%s525_s1 + $0xa8] sm:$0xff]  ;;  %v41_v12 = vld [vmem:[%s525_s1 + $0xa0] sm:$0xff]  ;;  %v55_v2 = vlaneseq }
   0x5   :  { %68 = vmatpush1.msra.mxu0 %v49_v4  ;;  %v40_v13 = vld [vmem:[%s525_s1 + $0x98] sm:$0xff]  ;;  %v39_v14 = vld [vmem:[%s525_s1 + $0x90] sm:$0xff]  ;;  %v38_v18 = vld [vmem:[%s525_s1 + $0x88] sm:$0xff] }
   0x6   :  { %69 = vmatprep.subr.mxu0 %v48_v5  ;;  %v169_v15 = vld [vmem:[%s526_s3 + $0xf8] sm:$0xff]  ;;  %v168_v17 = vld [vmem:[%s526_s3 + $0xf0] sm:$0xff]  ;;  %v37_v20 = vld [vmem:[%s525_s1 + $0x80] sm:$0xff]  ;;  %v56_v3 = vshrl.u32 %v55_v2, 7 }
   0x7   :  { %70 = vmatpush1.msra.mxu0 %v47_v6  ;;  %v153_v16 = vld [vmem:[%s526_s3 + $0x78] sm:$0xff]  ;;  %254 = vmatprep.subr.mxu1 %v169_v15  ;;  %v152_v19 = vld [vmem:[%s526_s3 + $0x70] sm:$0xff]  ;;  %v167_v21 = vld [vmem:[%s526_s3 + $0xe8] sm:$0xff] }
   0x8   :  { %71 = vmatprep.subr.mxu0 %v46_v7  ;;  %255 = vmatpush3.msra.mxu1 %v153_v16  ;;  %v36_v22 = vld [vmem:[%s525_s1 + $0x78] sm:$0xff]  ;;  %v151_v23 = vld [vmem:[%s526_s3 + $0x68] sm:$0xff]  ;;  %v35_v24 = vld [vmem:[%s525_s1 + $0x70] sm:$0xff]  ;;  %v57_v4 = vsub.s32 0, %v56_v3  ;;  %v61_v6 = vsub.s32 1, %v56_v3 }
   0x9   :  { %72 = vmatpush1.msra.mxu0 %v45_v8  ;;  %256 = vmatprep.subr.mxu1 %v168_v17  ;;  %v166_v25 = vld [vmem:[%s526_s3 + $0xe0] sm:$0xff]  ;;  %v34_v26 = vld [vmem:[%s525_s1 + $0x68] sm:$0xff]  ;;  %v165_v29 = vld [vmem:[%s526_s3 + $0xd8] sm:$0xff] }
   0xa   :  { %73 = vmatprep.subr.mxu0 %v44_v9  ;;  %257 = vmatpush3.msra.mxu1 %v152_v19  ;;  %v150_v27 = vld [vmem:[%s526_s3 + $0x60] sm:$0xff]  ;;  %v32_v30 = vld [vmem:[%s525_s1 + $0x58] sm:$0xff]  ;;  %v31_v32 = vld [vmem:[%s525_s1 + $0x50] sm:$0xff] }
   0xb   :  { %74 = vmatpush1.msra.mxu0 %v43_v10  ;;  %258 = vmatprep.subr.mxu1 %v167_v21  ;;  %v33_v28 = vld [vmem:[%s525_s1 + $0x60] sm:$0xff]  ;;  %v149_v31 = vld [vmem:[%s526_s3 + $0x58] sm:$0xff]  ;;  %v164_v33 = vld [vmem:[%s526_s3 + $0xd0] sm:$0xff] }
   0xc   :  { %75 = vmatprep.subr.mxu0 %v42_v11  ;;  %259 = vmatpush3.msra.mxu1 %v151_v23  ;;  %v30_v34 = vld [vmem:[%s525_s1 + $0x48] sm:$0xff]  ;;  %v148_v35 = vld [vmem:[%s526_s3 + $0x50] sm:$0xff]  ;;  %v29_v36 = vld [vmem:[%s525_s1 + $0x40] sm:$0xff] }
   0xd   :  { %76 = vmatpush1.msra.mxu0 %v41_v12  ;;  %260 = vmatprep.subr.mxu1 %v166_v25  ;;  %v163_v37 = vld [vmem:[%s526_s3 + $0xc8] sm:$0xff]  ;;  %v28_v38 = vld [vmem:[%s525_s1 + $0x38] sm:$0xff]  ;;  %v27_v40 = vld [vmem:[%s525_s1 + $0x30] sm:$0xff] }
   0xe   :  { %77 = vmatprep.subr.mxu0 %v40_v13  ;;  %261 = vmatpush3.msra.mxu1 %v150_v27  ;;  %v147_v39 = vld [vmem:[%s526_s3 + $0x48] sm:$0xff]  ;;  %v162_v41 = vld [vmem:[%s526_s3 + $0xc0] sm:$0xff]  ;;  %v161_v45 = vld [vmem:[%s526_s3 + $0xb8] sm:$0xff] }
   0xf   :  { %78 = vmatpush1.msra.mxu0 %v39_v14  ;;  %262 = vmatprep.subr.mxu1 %v165_v29  ;;  %v26_v42 = vld [vmem:[%s525_s1 + $0x28] sm:$0xff]  ;;  %v146_v43 = vld [vmem:[%s526_s3 + $0x40] sm:$0xff]  ;;  %v24_v46 = vld [vmem:[%s525_s1 + $0x18] sm:$0xff] }
  0x10   :  { %79 = vmatprep.subr.mxu0 %v38_v18  ;;  %263 = vmatpush3.msra.mxu1 %v149_v31  ;;  %v25_v44 = vld [vmem:[%s525_s1 + $0x20] sm:$0xff]  ;;  %v145_v47 = vld [vmem:[%s526_s3 + $0x38] sm:$0xff]  ;;  %v23_v48 = vld [vmem:[%s525_s1 + $0x10] sm:$0xff] }
  0x11   :  { %80 = vmatpush1.msra.mxu0 %v37_v20  ;;  %264 = vmatprep.subr.mxu1 %v164_v33  ;;  %v160_v49 = vld [vmem:[%s526_s3 + $0xb0] sm:$0xff]  ;;  %v22_v50 = vld [vmem:[%s525_s1 + $0x8] sm:$0xff]  ;;  %v21_v52 = vld [vmem:[%s525_s1] sm:$0xff] }
  0x12   :  { %81 = vmatprep.subr.mxu0 %v36_v22  ;;  %265 = vmatpush3.msra.mxu1 %v148_v35  ;;  %v144_v51 = vld [vmem:[%s526_s3 + $0x30] sm:$0xff]  ;;  %v159_v53 = vld [vmem:[%s526_s3 + $0xa8] sm:$0xff]  ;;  %v20_v54 = vld [vmem:[%s527_s0] sm:$0xf] }
  0x13   :  { %82 = vmatpush1.msra.mxu0 %v35_v24  ;;  %266 = vmatprep.subr.mxu1 %v163_v37  ;;  %v143_v55 = vld [vmem:[%s526_s3 + $0x28] sm:$0xff]  ;;  %v158_v56 = vld [vmem:[%s526_s3 + $0xa0] sm:$0xff]  ;;  %v157_v58 = vld [vmem:[%s526_s3 + $0x98] sm:$0xff] }
  0x14   :  { %83 = vmatprep.subr.mxu0 %v34_v26  ;;  %267 = vmatpush3.msra.mxu1 %v147_v39  ;;  %v142_v57 = vld [vmem:[%s526_s3 + $0x20] sm:$0xff]  ;;  %v141_v59 = vld [vmem:[%s526_s3 + $0x18] sm:$0xff]  ;;  %v156_v60 = vld [vmem:[%s526_s3 + $0x90] sm:$0xff] }
  0x15   :  { %84 = vmatpush1.msra.mxu0 %v33_v28  ;;  %268 = vmatprep.subr.mxu1 %v162_v41  ;;  %v140_v61 = vld [vmem:[%s526_s3 + $0x10] sm:$0xff]  ;;  %v155_v62 = vld [vmem:[%s526_s3 + $0x88] sm:$0xff]  ;;  %v154_v0 = vld [vmem:[%s526_s3 + $0x80] sm:$0xff] }
  0x16   :  { %85 = vmatprep.subr.mxu0 %v32_v30  ;;  %269 = vmatpush3.msra.mxu1 %v146_v43  ;;  %v139_v63 = vld [vmem:[%s526_s3 + $0x8] sm:$0xff]  ;;  %v138_v1 = vld [vmem:[%s526_s3] sm:$0xff] }
  0x17   :  { %86 = vmatpush1.msra.mxu0 %v31_v32  ;;  %270 = vmatprep.subr.mxu1 %v161_v45  ;;  %v53_v5 = vld [vmem:[%s528_s2] sm:$0x3] }
  0x18   :  { %87 = vmatprep.subr.mxu0 %v30_v34  ;;  %271 = vmatpush3.msra.mxu1 %v145_v47  ;;  %v58_v7 = vrot.slane %v53_v5, %v57_v4  ;;  %v62_v8 = vrot.slane %v53_v5, %v61_v6  ;;  %v253_v16 = vld [vmem:[%s529_s4] ss:$0 sm:$0xff] }
  0x19   :  { %88 = vmatpush1.msra.mxu0 %v29_v36  ;;  %272 = vmatprep.subr.mxu1 %v160_v49 }
  0x1a   :  { %89 = vmatprep.subr.mxu0 %v28_v38  ;;  %273 = vmatpush3.msra.mxu1 %v144_v51 }
  0x1b   :  { %90 = vmatpush1.msra.mxu0 %v27_v40  ;;  %274 = vmatprep.subr.mxu1 %v159_v53 }
  0x1c   :  { %91 = vmatprep.subr.mxu0 %v26_v42  ;;  %275 = vmatpush3.msra.mxu1 %v143_v55 }
  0x1d   :  { %92 = vmatpush1.msra.mxu0 %v25_v44  ;;  %276 = vmatprep.subr.mxu1 %v158_v56 }
  0x1e   :  { %93 = vmatprep.subr.mxu0 %v24_v46  ;;  %277 = vmatpush3.msra.mxu1 %v142_v57 }
  0x1f   :  { %94 = vmatpush1.msra.mxu0 %v23_v48  ;;  %278 = vmatprep.subr.mxu1 %v157_v58 }
  0x20   :  { %95 = vmatprep.subr.mxu0 %v22_v50  ;;  %279 = vmatpush3.msra.mxu1 %v141_v59 }
  0x21   :  { %96 = vmatpush1.msra.mxu0 %v21_v52  ;;  %280 = vmatprep.subr.mxu1 %v156_v60 }
  0x22   :  { %130 = vmatmul.mubr.f32.vlgmr.msra.gmra.mxu0 %v20_v54  ;;  %281 = vmatpush3.msra.mxu1 %v140_v61 }
  0x23   :  { %282 = vmatprep.subr.mxu1 %v155_v62 }
  0x24   :  { %283 = vmatpush3.msra.mxu1 %v139_v63 }
  0x25   :  { %284 = vmatprep.subr.mxu1 %v154_v0 }
  0x26   :  { %285 = vmatpush3.msra.mxu1 %v138_v1 }
  0xe2   :  { %v131_v9 = vpop.f32.mrf.mxu0 }
  0xe3   :  { %v132_v10 = vadd.f32 %v131_v9, %v58_v7 }
  0xe4   :  { %v133_v11 = vpop.f32.mrf.mxu0 }
  0xe5   :  { %v134_v12 = vadd.f32 %v133_v11, %v62_v8  ;;  %v136_v14 = vmax.f32 %v132_v10, 0.0 }
  0xe7   :  { %v137_v13 = vmax.f32 %v134_v12, 0.0 }
  0xe9   :  { %241 = vmatprep.mubr.f32.mxu1 %v137_v13 }
  0xea   :  { %242 = vmatmul.mubr.f32.vlgmr.msra.gmra.mxu1 %v136_v14 }
 0x1aa   :  { %v286_v15 = vpop.f32.mrf.mxu1 }
 0x1ac   :  { %v287_v17 = vpop.f32.mrf.mxu1 }
 0x1ad   :  { %v288_v18 = vadd.f32 %v287_v17, %v286_v15 }
 0x1af   :  { %v244_v19 = vadd.f32 %v288_v18, %v253_v16 }
 0x1b1   :  { %248 = vst.msk [vmem:[%s530_s5] sm:$0xf] %vm247_vm0, %v244_v19 }

</bundles_post_ra>
